<compile_context>
chip_gen: v6e
topology: v6e:2x2x1
jax: 0.10.0
libtpu: 0.0.40
codegen_flags: <defaults>
</compile_context>

<pallas_src>
from functools import partial

import jax
import jax.numpy as jnp
from jax.experimental import pallas as pl
from jax.experimental.pallas import tpu as pltpu


_NEG_INF = jnp.float32(-1e30)  # large finite "masked" value: fully-masked rows give a
                               # uniform row instead of PyTorch's NaN (deliberate guard)


# ---------------------------------------------------------------------------
# Tiled linear kernel:  y = x @ W^T + b   (weight is pre-transposed in wrapper)
# ---------------------------------------------------------------------------
def _linear_kernel(x_ref, wt_ref, b_ref, o_ref):
    # wt_ref is already (E_in, E_out): no in-kernel transpose / relayout.
    acc = jnp.dot(x_ref[...], wt_ref[...], preferred_element_type=jnp.float32)
    o_ref[...] = (acc + b_ref[...]).astype(o_ref.dtype)


def pallas_linear(x, w, b, *, compute_dtype=jnp.bfloat16, tile_m=512):
    """x: (M, E_in), w: (E_out, E_in) [PyTorch layout], b: (E_out,) or None -> (M, E_out) f32."""
    M, E_in = x.shape
    E_out = w.shape[0]
    # One-time wrapper-side transpose + cast (MXU consumes bf16 at 2x throughput,
    # f32 accumulation keeps accuracy).
    w_t = jnp.asarray(w, jnp.float32).T.astype(compute_dtype)          # (E_in, E_out)
    if b is None:
        b = jnp.zeros((E_out,), jnp.float32)
    b2 = jnp.asarray(b, jnp.float32).reshape(1, E_out)
    x_c = jnp.asarray(x).astype(compute_dtype)

    # TODO(synk): for very large E_in / E_out the weight should also be tiled
    # (extra grid axes over K and N); here only M is tiled.
    if M <= tile_m:
        tm, grid_m, m_pad, x_pad = M, 1, M, x_c      # full-extent block: always legal
    else:
        tm = tile_m
        m_pad = pl.cdiv(M, tm) * tm
        x_pad = jnp.pad(x_c, ((0, m_pad - M), (0, 0))) if m_pad != M else x_c
        grid_m = m_pad // tm

    out = pl.pallas_call(
        _linear_kernel,
        out_shape=jax.ShapeDtypeStruct((m_pad, E_out), jnp.float32),
        grid=(grid_m,),
        in_specs=[
            pl.BlockSpec((tm, E_in), lambda i: (i, 0)),
            pl.BlockSpec((E_in, E_out), lambda i: (0, 0)),
            pl.BlockSpec((1, E_out), lambda i: (0, 0)),
        ],
        out_specs=pl.BlockSpec((tm, E_out), lambda i: (i, 0)),
        compiler_params=pltpu.CompilerParams(dimension_semantics=("parallel",)),
    )(x_pad, w_t, b2)
    return out[:M] if m_pad != M else out


# ---------------------------------------------------------------------------
# Attention kernel: a block of batch-heads per grid step (batched einsum)
# ---------------------------------------------------------------------------
def _attn_kernel(*refs, num_heads, with_mask, need_weights, approx_recip):
    n_in = 4 if with_mask else 3
    q_ref, k_ref, v_ref = refs[0], refs[1], refs[2]
    m_ref = refs[3] if with_mask else None
    o_ref = refs[n_in]
    w_ref = refs[n_in + 1] if need_weights else None

    # 1/sqrt(Dh) is already folded into the q projection weights (wrapper side).
    q = q_ref[...]                                   # (B, Lq, Dh)  compute dtype
    k = k_ref[...]                                   # (B, Lk, Dh)
    v = v_ref[...]                                   # (B, Lk, Dh)
    s = jnp.einsum("bqd,bkd->bqk", q, k, preferred_element_type=jnp.float32)
    if m_ref is not None:
        s = s + m_ref[...]                           # broadcasts (1|B, 1|Lq, Lk), f32

    # numerically-stable softmax in f32 (matches torch.softmax)
    s = s - jnp.max(s, axis=-1, keepdims=True)
    p = jnp.exp(s)
    denom = jnp.sum(p, axis=-1, keepdims=True)
    if approx_recip:
        p = p * pl.reciprocal(denom, approx=True)    # EUP slot: near-free
    else:
        p = p / denom

    o_ref[...] = jnp.einsum("bqk,bkd->bqd", p.astype(v.dtype), v,
                            preferred_element_type=jnp.float32).astype(o_ref.dtype)

    if w_ref is not None:
        # Average over heads in-kernel: HBM store shrinks by num_heads.
        B, Lq, Lk = p.shape
        w_ref[...] = jnp.mean(p.reshape(B // num_heads, num_heads, Lq, Lk), axis=1)


def _pick_batches_per_block(N, num_heads, Lq, Lk, Dh):
    # Keep one grid step's f32 working set a few MiB so double-buffered blocks
    # stay well inside the 32 MiB scoped-VMEM default on every generation.
    per_batch = num_heads * (Lq * Lk + Lq * Dh + 2 * Lk * Dh) * 4
    nb = max(1, min(N, (4 * 1024 * 1024) // max(per_batch, 1)))
    if N >= 2:
        # keep grid extent >= 2 so v7x megacore can split steps across the 2 TCs
        nb = max(1, min(nb, N // 2))
    while N % nb:
        nb -= 1
    return nb


def pallas_attention(qh, kh, vh, mask_arr, num_heads, *, need_weights,
                     compute_dtype=jnp.bfloat16, approx_recip=True):
    """qh: (N*H, Lq, Dh), kh/vh: (N*H, Lk, Dh), mask_arr: None | (1,Lq,Lk) | (N*H,1,Lk) | (N*H,Lq,Lk)."""
    BH, Lq, Dh = qh.shape
    Lk = kh.shape[1]
    N = BH // num_heads
    nb = _pick_batches_per_block(N, num_heads, Lq, Lk, Dh)
    b_blk = nb * num_heads
    grid = (N // nb,)

    qh = qh.astype(compute_dtype)
    kh = kh.astype(compute_dtype)
    vh = vh.astype(compute_dtype)

    in_arrays = [qh, kh, vh]
    in_specs = [
        pl.BlockSpec((b_blk, Lq, Dh), lambda i: (i, 0, 0)),
        pl.BlockSpec((b_blk, Lk, Dh), lambda i: (i, 0, 0)),
        pl.BlockSpec((b_blk, Lk, Dh), lambda i: (i, 0, 0)),
    ]
    with_mask = mask_arr is not None
    if with_mask:
        m0, m1 = mask_arr.shape[0], mask_arr.shape[1]
        if m0 == 1:
            # same (Lq, Lk) mask for every batch-head: broadcast via index_map
            in_specs.append(pl.BlockSpec((1, m1, Lk), lambda i: (0, 0, 0)))
        else:
            in_specs.append(pl.BlockSpec((b_blk, m1, Lk), lambda i: (i, 0, 0)))
        in_arrays.append(mask_arr.astype(jnp.float32))

    out_shapes = [jax.ShapeDtypeStruct((BH, Lq, Dh), jnp.float32)]
    out_specs = [pl.BlockSpec((b_blk, Lq, Dh), lambda i: (i, 0, 0))]
    if need_weights:
        out_shapes.append(jax.ShapeDtypeStruct((N, Lq, Lk), jnp.float32))
        out_specs.append(pl.BlockSpec((nb, Lq, Lk), lambda i: (i, 0, 0)))

    kernel = partial(_attn_kernel, num_heads=num_heads, with_mask=with_mask,
                     need_weights=need_weights, approx_recip=approx_recip)

    # TODO(synk): for very long sequences the full (Lq, Lk) score block should be
    # replaced by a flash-style Lk-tiled online softmax (v7x 64 MiB VMEM).
    if need_weights:
        res = pl.pallas_call(
            kernel, out_shape=tuple(out_shapes), grid=grid,
            in_specs=in_specs, out_specs=out_specs,
            compiler_params=pltpu.CompilerParams(dimension_semantics=("parallel",)),
        )(*in_arrays)
        return res[0], res[1]
    res = pl.pallas_call(
        kernel, out_shape=out_shapes[0], grid=grid,
        in_specs=in_specs, out_specs=out_specs[0],
        compiler_params=pltpu.CompilerParams(dimension_semantics=("parallel",)),
    )(*in_arrays)
    return res, None


# ---------------------------------------------------------------------------
# Mask construction (PyTorch semantics; no (N*H, Lq, Lk) zeros materialized)
# ---------------------------------------------------------------------------
def _to_additive(mask):
    mask = jnp.asarray(mask)
    if mask.dtype == jnp.bool_:
        # PyTorch: True = masked -> additive -inf (guarded large-negative here)
        return jnp.where(mask, _NEG_INF, jnp.float32(0.0))
    return mask.astype(jnp.float32)


def _build_additive_mask(attn_mask, key_padding_mask, N, H, Lq, Lk):
    am = None
    if attn_mask is not None:
        am = _to_additive(attn_mask)
        if am.ndim == 2:
            am = am[None]                                   # (1, Lq, Lk): broadcast via index_map
        # 3-D attn_mask is already (N*H, Lq, Lk)
    kpm = None
    if key_padding_mask is not None:
        kpm = _to_additive(key_padding_mask)                # (N, Lk) additive
        kpm = jnp.broadcast_to(kpm[:, None, None, :], (N, H, 1, Lk)).reshape(N * H, 1, Lk)
    if am is None and kpm is None:
        return None
    if kpm is None:
        return am
    if am is None:
        return kpm
    return am + kpm                                         # (N*H, Lq, Lk)


# ---------------------------------------------------------------------------
# Module-equivalent forward
# ---------------------------------------------------------------------------
def multiheadattention_forward(
    q, k, v, attn_mask, key_padding_mask, params, *,
    embed_dim, num_heads, dropout=0.0, batch_first=True,
    need_weights=True, training=False, compute_dtype=jnp.bfloat16,
):
    self_attention = (k is None) and (v is None)
    if k is None:
        k = q
    if v is None:
        v = q
    assert batch_first, "# layout: this implementation keeps batch-first (N, L, E)"

    N, Lq, E = q.shape
    Lk = k.shape[1]
    assert E == embed_dim
    head_dim = E // num_heads
    scale = float(head_dim) ** -0.5

    # Fold the 1/sqrt(Dh) scale into the q projection (zero runtime cost).
    q_w = jnp.asarray(params["q_w"], jnp.float32) * scale
    q_b = jnp.asarray(params["q_b"], jnp.float32) * scale
    k_w = jnp.asarray(params["k_w"], jnp.float32)
    k_b = jnp.asarray(params["k_b"], jnp.float32)
    v_w = jnp.asarray(params["v_w"], jnp.float32)
    v_b = jnp.asarray(params["v_b"], jnp.float32)

    if self_attention:
        # Fused QKV projection: read x once, 3x wider MXU N-dim, 1 kernel launch.
        w_in = jnp.concatenate([q_w, k_w, v_w], axis=0)     # (3E, E)
        b_in = jnp.concatenate([q_b, k_b, v_b], axis=0)     # (3E,)
        qkv = pallas_linear(q.reshape(N * Lq, E), w_in, b_in, compute_dtype=compute_dtype)
        qp = qkv[:, :E].reshape(N, Lq, E)
        kp = qkv[:, E:2 * E].reshape(N, Lq, E)
        vp = qkv[:, 2 * E:].reshape(N, Lq, E)
    else:
        qp = pallas_linear(q.reshape(N * Lq, E), q_w, q_b, compute_dtype=compute_dtype).reshape(N, Lq, E)
        kp = pallas_linear(k.reshape(N * Lk, E), k_w, k_b, compute_dtype=compute_dtype).reshape(N, Lk, E)
        vp = pallas_linear(v.reshape(N * Lk, E), v_w, v_b, compute_dtype=compute_dtype).reshape(N, Lk, E)

    # Split heads: (N, L, E) -> (N*H, L, Dh), batch-head index n*H + h (matches PyTorch).
    # TODO(synk): head split/merge left to XLA transposes; could be folded into
    # BlockSpec index maps over an (n, h) grid for an extra copy saving.
    def split_heads(x, L):
        return (x.reshape(N, L, num_heads, head_dim)
                 .transpose(0, 2, 1, 3)
                 .reshape(N * num_heads, L, head_dim))

    qh, kh, vh = split_heads(qp, Lq), split_heads(kp, Lk), split_heads(vp, Lk)

    mask_arr = _build_additive_mask(attn_mask, key_padding_mask, N, num_heads, Lq, Lk)

    # TODO(synk): attention dropout (dropout>0 and training=True) not implemented —
    # torch RNG stream cannot be matched; example uses training=False / dropout=0.
    attn_out_h, attn_weights = pallas_attention(
        qh, kh, vh, mask_arr, num_heads, need_weights=need_weights,
        compute_dtype=compute_dtype,
        approx_recip=(compute_dtype != jnp.float32))

    # Merge heads back: (N*H, Lq, Dh) -> (N, Lq, E)
    attn_out = (attn_out_h.reshape(N, num_heads, Lq, head_dim)
                .transpose(0, 2, 1, 3)
                .reshape(N, Lq, E))

    out = pallas_linear(attn_out.reshape(N * Lq, E), params["out_w"], params["out_b"],
                        compute_dtype=compute_dtype).reshape(N, Lq, E)

    return out, (attn_weights if need_weights else None)


# ---------------------------------------------------------------------------
# Pure-JAX reference (for correctness check)
# ---------------------------------------------------------------------------
def reference_forward(q, k, v, params, num_heads, attn_mask=None, key_padding_mask=None):
    N, Lq, E = q.shape
    Lk = k.shape[1]
    H, Dh = num_heads, E // num_heads
    scale = float(Dh) ** -0.5
    qp = q @ params["q_w"].T + params["q_b"]
    kp = k @ params["k_w"].T + params["k_b"]
    vp = v @ params["v_w"].T + params["v_b"]
    qh = qp.reshape(N, Lq, H, Dh).transpose(0, 2, 1, 3)
    kh = kp.reshape(N, Lk, H, Dh).transpose(0, 2, 1, 3)
    vh = vp.reshape(N, Lk, H, Dh).transpose(0, 2, 1, 3)
    s = jnp.einsum("nhqd,nhkd->nhqk", qh * scale, kh)
    if attn_mask is not None:
        am = _to_additive(attn_mask)
        s = s + (am[None, None] if am.ndim == 2 else am.reshape(N, H, Lq, Lk))
    if key_padding_mask is not None:
        s = s + _to_additive(key_padding_mask)[:, None, None, :]
    p = jax.nn.softmax(s, axis=-1)
    o = jnp.einsum("nhqk,nhkd->nhqd", p, vh)
    o = o.transpose(0, 2, 1, 3).reshape(N, Lq, E)
    out = o @ params["out_w"].T + params["out_b"]
    return out, p.mean(axis=1)


# ---------------------------------------------------------------------------
if __name__ == "__main__":
    # Small config consistent with the module: seq=8, batch=2, embed_dim=32, heads=4.
    N, L, E, H = 2, 8, 32, 4
    key = jax.random.PRNGKey(0)
    keys = jax.random.split(key, 12)

    init = lambda kk, shape: (jax.random.normal(kk, shape, jnp.float32) * (E ** -0.5))
    params = {
        "q_w": init(keys[0], (E, E)), "k_w": init(keys[1], (E, E)),
        "v_w": init(keys[2], (E, E)), "out_w": init(keys[3], (E, E)),
        "q_b": init(keys[4], (E,)), "k_b": init(keys[5], (E,)),
        "v_b": init(keys[6], (E,)), "out_b": init(keys[7], (E,)),
    }

    q = jax.random.normal(keys[8], (N, L, E), jnp.float32)
    k = jax.random.normal(keys[9], (N, L, E), jnp.float32)
    v = jax.random.normal(keys[10], (N, L, E), jnp.float32)

    ref_out, ref_w = reference_forward(q, k, v, params, H)

    # 1) cross-attention, f32 compute path: tight correctness check.
    out32, w32 = multiheadattention_forward(
        q, k, v, attn_mask=None, key_padding_mask=None, params=params,
        embed_dim=E, num_heads=H, dropout=0.0, batch_first=True,
        need_weights=True, training=False, compute_dtype=jnp.float32)
    out32 = jax.block_until_ready(out32)
    w32 = jax.block_until_ready(w32)
    assert out32.shape == (N, L, E) and w32.shape == (N, L, L)
    assert jnp.allclose(out32, ref_out, atol=1e-4, rtol=1e-4)
    assert jnp.allclose(w32, ref_w, atol=1e-5, rtol=1e-5)

    # 2) default bf16-MXU path (the performance configuration): loose check.
    out16, w16 = multiheadattention_forward(
        q, k, v, attn_mask=None, key_padding_mask=None, params=params,
        embed_dim=E, num_heads=H, dropout=0.0, batch_first=True,
        need_weights=True, training=False)
    out16 = jax.block_until_ready(out16)
    assert jnp.allclose(out16, ref_out, atol=5e-2, rtol=5e-2)
    assert jnp.allclose(w16, ref_w, atol=3e-2, rtol=3e-2)

    # 3) fused self-attention path (k=v=None) with a boolean causal attn_mask
    #    (True = masked, PyTorch semantics) and need_weights=False.
    causal = jnp.triu(jnp.ones((L, L), dtype=bool), k=1)
    out_sa, w_sa = multiheadattention_forward(
        q, None, None, attn_mask=causal, key_padding_mask=None, params=params,
        embed_dim=E, num_heads=H, dropout=0.0, batch_first=True,
        need_weights=False, training=False, compute_dtype=jnp.float32)
    out_sa = jax.block_until_ready(out_sa)
    ref_sa, _ = reference_forward(q, q, q, params, H, attn_mask=causal)
    assert w_sa is None
    assert jnp.allclose(out_sa, ref_sa, atol=1e-4, rtol=1e-4)

    print("KERNEL_OK")
</pallas_src>

<mosaic_0001>
module attributes {stable_mosaic.version = 11 : i64} {
  func.func @_linear_kernel(%arg0: i32, %arg1: memref<16x32xf32, #tpu.memory_space<vmem>>, %arg2: memref<32x32xf32, #tpu.memory_space<vmem>>, %arg3: memref<1x32xf32, #tpu.memory_space<vmem>>, %arg4: memref<16x32xf32, #tpu.memory_space<vmem>>) attributes {dimension_semantics = [#tpu.dimension_semantics<parallel>], iteration_bounds = array<i64: 1>, scalar_prefetch = 0 : i64, scratch_operands = 0 : i64, tpu.core_type = #tpu.core_type<tc>, window_params = [{transform_indices = @transform_0, window_bounds = array<i64: 16, 32>}, {pipeline_mode = #tpu.pipeline_mode<synchronous>, transform_indices = @transform_1, window_bounds = array<i64: 32, 32>}, {pipeline_mode = #tpu.pipeline_mode<synchronous>, transform_indices = @transform_2, window_bounds = array<i64: 1, 32>}, {transform_indices = @transform_3, window_bounds = array<i64: 16, 32>}]} {
    %c0 = arith.constant 0 : index
    %c0_0 = arith.constant 0 : index
    %0 = vector.load %arg1[%c0, %c0_0] : memref<16x32xf32, #tpu.memory_space<vmem>>, vector<16x32xf32>
    %c0_1 = arith.constant 0 : index
    %c0_2 = arith.constant 0 : index
    %1 = vector.load %arg2[%c0_1, %c0_2] : memref<32x32xf32, #tpu.memory_space<vmem>>, vector<32x32xf32>
    %cst = arith.constant dense<0.000000e+00> : vector<16x32xf32>
    %2 = tpu.matmul %0, %1, %cst {dimension_numbers = #tpu.dot_dimension_numbers<[1], [0], [0], [1], [0, 0, 1, 1], [], []>} : vector<16x32xf32>, vector<32x32xf32>, vector<16x32xf32> -> vector<16x32xf32>
    %c0_3 = arith.constant 0 : index
    %c0_4 = arith.constant 0 : index
    %3 = vector.load %arg3[%c0_3, %c0_4] : memref<1x32xf32, #tpu.memory_space<vmem>>, vector<1x32xf32>
    %4 = vector.broadcast %3 : vector<1x32xf32> to vector<16x32xf32>
    %5 = arith.addf %2, %4 : vector<16x32xf32>
    %c0_5 = arith.constant 0 : index
    %c0_6 = arith.constant 0 : index
    %6 = vector.load %arg4[%c0_5, %c0_6] : memref<16x32xf32, #tpu.memory_space<vmem>>, vector<16x32xf32>
    tpu.vector_store %arg4[%c0_5, %c0_6], %5 {strides = array<i32>} : memref<16x32xf32, #tpu.memory_space<vmem>>, vector<16x32xf32>,
    return
  }
  func.func @transform_0(%arg0: i32) -> (i32, i32) {
    %c0_i32 = arith.constant 0 : i32
    %c0_i32_0 = arith.constant 0 : i32
    return %arg0, %c0_i32 : i32, i32
  }
  func.func @transform_1(%arg0: i32) -> (i32, i32) {
    %c0_i32 = arith.constant 0 : i32
    %c0_i32_0 = arith.constant 0 : i32
    %c0_i32_1 = arith.constant 0 : i32
    return %c0_i32, %c0_i32_0 : i32, i32
  }
  func.func @transform_2(%arg0: i32) -> (i32, i32) {
    %c0_i32 = arith.constant 0 : i32
    %c0_i32_0 = arith.constant 0 : i32
    %c0_i32_1 = arith.constant 0 : i32
    return %c0_i32, %c0_i32_0 : i32, i32
  }
  func.func @transform_3(%arg0: i32) -> (i32, i32) {
    %c0_i32 = arith.constant 0 : i32
    %c0_i32_0 = arith.constant 0 : i32
    return %arg0, %c0_i32 : i32, i32
  }
}

</mosaic_0001>

<bundles_post_ra>
// kernel: tpu_custom_call.1
= control target key start
LH: loop header
LB: loop body
LE: loop exit
PB: predicated region body
PF: predicated region fallthrough
CT: control target
= control target key end

     0   :  { %8 = vsyncpa [#allocation3], 0  ;;  %s299_s0 = inlined_call_operand.hbm [shape: f32[16,32], index: 0, kind: input, shape index: {}]   ;;  %s300_s1 = inlined_call_operand.hbm [shape: f32[32,32], index: 1, kind: input, shape index: {}]   ;;  %s301_s2 = inlined_call_operand.vmem [shape: f32[1,32], index: 2, kind: input, shape index: {}]   ;;  %s302_s3 = inlined_call_operand.hbm [shape: f32[16,32], index: 3, kind: output, shape index: {}]  }
   0x1   :  { %9 = vsyncpa [#allocation6], 0 }
   0x2   :  { %10 = vsyncpa [#allocation4], 0  ;;  %s249_s12 = smov [#allocation2]  }
   0x3   :  { %s16_s13 = sshll.u32 %s249_s12, 4  ;;  %s17_s13 = int_to_ptr.vmem [resolvable:$true] %s16_s13 }
   0x4   :  { %s191_s14 = scalar_lea.vmem %s17_s13, 256  ;;  %p196_p1 = scmp.lt.s32.totalorder %s17_s13, %s17_s13 }
   0x5   :  { %p192_p0 = scmp.ne.s32.totalorder %s17_s13, %s191_s14  ;;  %p197_p2 = scmp.lt.s32.totalorder %s191_s14, %s191_s14 }
   0x7   :  { %p198_p3 = por %p197_p2, %p196_p1 }
   0x9   :  { %p199_p4 = pnand %p198_p3, %p192_p0 }
   0xb   :  { %202 = shalt.err (!%p199_p4)
}
   0xc   :  { %s250_s15 = smov 128   ;;  %s251_s16 = smov 8  }
   0xd   :  { %22 = dma.hbm_to_vmem [thread:$0]  %s299_s0, 256, %s17_s13, [#allocation3], %s250_s15, %s250_s15, %s251_s16  }
   0xe   :  { %s252_s19 = smov [#allocation5]  }
   0xf   :  { %s28_s20 = sshll.u32 %s252_s19, 4  ;;  %s29_s20 = int_to_ptr.vmem [resolvable:$true] %s28_s20 }
  0x10   :  { %s211_s21 = scalar_lea.vmem %s29_s20, 512  ;;  %p216_p6 = scmp.lt.s32.totalorder %s29_s20, %s29_s20 }
  0x11   :  { %p212_p5 = scmp.ne.s32.totalorder %s29_s20, %s211_s21  ;;  %p217_p7 = scmp.lt.s32.totalorder %s211_s21, %s211_s21 }
  0x13   :  { %p218_p8 = por %p217_p7, %p216_p6 }
  0x15   :  { %p219_p9 = pnand %p218_p8, %p212_p5 }
  0x17   :  { %222 = shalt.err (!%p219_p9)
}
  0x18   :  { %34 = dma.hbm_to_vmem [thread:$0]  %s300_s1, 512, %s29_s20, [#allocation6], %s250_s15, %s250_s15, %s251_s16  }
  0x19   :  { %243 = dma.done.wait [#allocation3], 256  }
  0x1a   :  { %244 = vsyncadd [#allocation3], 4294967040 }
  0x1b   :  { %245 = dma.done.wait [#allocation6], 512  }
  0x1c   :  { %246 = vsyncadd [#allocation6], 4294966784  ;;  %vm56_vm0 = vcmask 261120   ;;  %v48_v0 = vld [vmem:[#allocation5 + $0x18] sm:$0xff]  ;;  %v47_v1 = vld [vmem:[#allocation5 + $0x10] sm:$0xff]  ;;  %s253_s24 = smov [#allocation7]  }
  0x1d   :  { %167 = vmatprep.subr.mxu0 %v48_v0  ;;  %v43_v2 = vld [vmem:[#allocation2] sm:$0xff]  ;;  %v46_v3 = vld [vmem:[#allocation5 + $0x8] sm:$0xff]  ;;  %v45_v4 = vld [vmem:[#allocation5] sm:$0xff]  ;;  %s145_s25 = sshll.u32 %s253_s24, 4  ;;  %s146_s25 = int_to_ptr.vmem [resolvable:$true] %s145_s25 }
  0x1e   :  { %168 = vmatpush3.msra.mxu0 %v48_v0  ;;  %175 = vmatprep.mubr.msk.f32.mxu0 %vm56_vm0, %v43_v2  ;;  %v44_v5 = vld [vmem:[#allocation2 + $0x8] sm:$0xff]  ;;  %v158_v6 = vld [vmem:[%s301_s2] ss:$0 sm:$0xff]  ;;  %s223_s26 = scalar_lea.vmem %s146_s25, 256  ;;  %p228_p11 = scmp.lt.s32.totalorder %s146_s25, %s146_s25 }
  0x1f   :  { %169 = vmatprep.subr.mxu0 %v47_v1  ;;  %p224_p10 = scmp.ne.s32.totalorder %s146_s25, %s223_s26  ;;  %p229_p12 = scmp.lt.s32.totalorder %s223_s26, %s223_s26 }
  0x20   :  { %170 = vmatpush3.msra.mxu0 %v47_v1 }
  0x21   :  { %171 = vmatprep.subr.mxu0 %v46_v3  ;;  %p230_p13 = por %p229_p12, %p228_p11 }
  0x22   :  { %172 = vmatpush3.msra.mxu0 %v46_v3 }
  0x23   :  { %173 = vmatprep.subr.mxu0 %v45_v4  ;;  %p231_p0 = pnand %p230_p13, %p224_p10 }
  0x24   :  { %174 = vmatpush3.msra.mxu0 %v45_v4 }
  0x25   :  { %176 = vmatmul.mubr.msk.f32.vlgmr.msra.gmra.mxu0 %vm56_vm0, %v44_v5 }
  0xe5   :  { %v177_v7 = vpop.f32.mrf.mxu0 }
  0xe6   :  { %v135_v8 = vadd.f32 %v177_v7, %v158_v6 }
  0xe7   :  { %v129_v9 = vpop.f32.mrf.mxu0 }
  0xe8   :  { %139 = vst.msk [vmem:[#allocation7 + $0x8] sm:$0xff] %vm56_vm0, %v135_v8  ;;  %v130_v10 = vadd.f32 %v158_v6, %v129_v9 }
  0xea   :  { %138 = vst.msk [vmem:[#allocation7] sm:$0xff] %vm56_vm0, %v130_v10 }
  0xeb   :  { %234 = shalt.err (!%p231_p0)
}
  0xec   :  { %151 = dma.vmem_to_hbm [thread:$0]  %s146_s25, 256, %s302_s3, [#allocation4], %s250_s15, %s250_s15, %s251_s16  }
  0xed   :  { %247 = dma.done.wait [#allocation4], 256  }
  0xee   :  { %248 = vsyncadd [#allocation4], 4294967040 }
  0xef   :  { %155 = vsyncpa [#allocation3], 1 }
  0xf0   :  { %156 = vsyncpa [#allocation6], 1 }
  0xf1   :  { %157 = vsyncpa [#allocation4], 1 }

</bundles_post_ra>
